<compile_context>
chip_gen: v7x
topology: tpu7x:2x2x1
jax: 0.10.0
libtpu: 0.0.40
codegen_flags: <defaults>
</compile_context>

<pallas_src>
import itertools

import jax
import jax.numpy as jnp
import numpy as np
from jax.experimental import pallas as pl
from jax.experimental.pallas import tpu as pltpu


def _round_up(x, m):
    return ((x + m - 1) // m) * m


def _pad_to(x, shape):
    pads = [(0, s - d) for d, s in zip(x.shape, shape)]
    if all(p == (0, 0) for p in pads):
        return x
    return jnp.pad(x, pads)


def _vmem_capacity_bytes():
    """Physical per-core VMEM, with a conservative fallback."""
    try:
        info = pltpu.get_tpu_info()
        cap = getattr(info, "vmem_capacity_bytes", None)
        if cap:
            return int(cap)
    except Exception:
        pass
    return 64 * 1024 * 1024  # v7x per-TC VMEM (smallest of v5e/v6e/v7x)


def _choose_batch_block(B, vmem_cap_blk):
    """Largest divisor of B that fits the VMEM budget and keeps at least
    min(B, 4) grid steps (pipeline overlap; v7x dual-TC sharding).  Prefers an
    even number of grid steps when possible."""
    cap = max(1, min(B, int(vmem_cap_blk)))
    min_blocks = min(B, 4)
    divisors = [d for d in range(1, B + 1) if B % d == 0 and d <= cap]

    def score(d):
        nb = B // d
        return (nb >= min_blocks, nb % 2 == 0 or nb == 1, d)

    return max(divisors, key=score)


def _make_cost_kernel(cost_class_w, cost_giou_w):
    """Pallas kernel computing the matching cost for a block of batch elems.

    Scalar weights are captured as plain Python floats (jaxpr literals), never
    as jnp arrays, to avoid the 'kernel captures constants' lowering error.
    """
    wc = float(cost_class_w)
    wg = float(cost_giou_w)
    eps = 1e-12

    def kernel(logits_ref, pfeat_ref, tfeat_ref, onehotT_ref, cost_ref):
        logits = logits_ref[...]        # [Bb, Qp, C]  f32
        pfeat = pfeat_ref[...]          # [Bb, Qp, 8]  f32 (wb*cx,wb*cy,wb*w,wb*h,x1,y1,x2,y2)
        tfeat = tfeat_ref[...]          # [Bb, 8, Tp]  f32 coord-major, same order
        onehotT = onehotT_ref[...]      # [Bb, C, Tp]  bf16

        # ---- softmax over classes (stable); fold -wc into the per-row
        # normalizer (exact divide on the tiny [Bb,Qp,1] tensor) -------------
        m = jnp.max(logits, axis=-1, keepdims=True)
        e = jnp.exp(logits - m)
        neg_wc_inv = (-wc) / jnp.sum(e, axis=-1, keepdims=True)   # [Bb, Qp, 1]
        p_scaled = (e * neg_wc_inv).astype(jnp.bfloat16)          # = -wc*softmax

        # ---- classification cost: (-wc*prob) gathered at target ids via a
        # bf16 one-hot MXU matmul, accumulated in f32 -------------------------
        p_cls = jnp.einsum("bqc,bct->bqt", p_scaled, onehotT,
                           preferred_element_type=jnp.float32)    # [Bb, Qp, Tp]

        # ---- unpack pred (column slices) / target (row slices) coords -------
        ocx = pfeat[:, :, 0:1]; ocy = pfeat[:, :, 1:2]            # wb-scaled cxcywh
        ow  = pfeat[:, :, 2:3]; oh  = pfeat[:, :, 3:4]
        ox1 = pfeat[:, :, 4:5]; oy1 = pfeat[:, :, 5:6]            # unscaled xyxy
        ox2 = pfeat[:, :, 6:7]; oy2 = pfeat[:, :, 7:8]

        tcx = tfeat[:, 0:1, :]; tcy = tfeat[:, 1:2, :]
        tw  = tfeat[:, 2:3, :]; th  = tfeat[:, 3:4, :]
        tx1 = tfeat[:, 4:5, :]; ty1 = tfeat[:, 5:6, :]
        tx2 = tfeat[:, 6:7, :]; ty2 = tfeat[:, 7:8, :]

        # ---- running cost: wb*L1 (weights pre-folded) + class cost ----------
        cost = (jnp.abs(ocx - tcx) + jnp.abs(ocy - tcy)
                + jnp.abs(ow - tw) + jnp.abs(oh - th))            # [Bb, Qp, Tp]
        cost = cost + p_cls

        # ---- pairwise GIoU (xyxy precomputed host-side); accumulate early so
        # at most ~3 full QpxTp f32 tiles stay live ---------------------------
        inter = (jnp.maximum(jnp.minimum(ox2, tx2) - jnp.maximum(ox1, tx1), 0.0)
                 * jnp.maximum(jnp.minimum(oy2, ty2) - jnp.maximum(oy1, ty1), 0.0))
        area1 = (jnp.maximum(ox2 - ox1, 0.0)
                 * jnp.maximum(oy2 - oy1, 0.0))                   # [Bb, Qp, 1]
        area2 = (jnp.maximum(tx2 - tx1, 0.0)
                 * jnp.maximum(ty2 - ty1, 0.0))                   # [Bb, 1, Tp]
        union = area1 + area2 - inter                             # [Bb, Qp, Tp]
        # -wg * iou  (eps clamp guards rcp(0) for degenerate / padded boxes)
        cost = cost - wg * (inter
                            * pl.reciprocal(jnp.maximum(union, eps), approx=True))
        # inter is now dead; compute the convex hull area.
        convex = (jnp.maximum(jnp.maximum(ox2, tx2) - jnp.minimum(ox1, tx1), 0.0)
                  * jnp.maximum(jnp.maximum(oy2, ty2) - jnp.minimum(oy1, ty1), 0.0))
        # wg * (convex - union)/convex == wg - wg * union/convex
        cost_ref[...] = (cost
                         - wg * (union * pl.reciprocal(jnp.maximum(convex, eps),
                                                       approx=True))
                         + wg)

    return kernel


def compute_cost_matrices(pred_logits, pred_boxes, tgt_labels, tgt_boxes,
                          cost_class=1.0, cost_bbox=1.0, cost_giou=1.0):
    """Computes the [B, Q, T] matching cost matrix with a Pallas TPU kernel."""
    pred_logits = jnp.asarray(pred_logits, jnp.float32)
    pred_boxes = jnp.asarray(pred_boxes, jnp.float32)
    tgt_boxes = jnp.asarray(tgt_boxes, jnp.float32)
    tgt_labels = jnp.asarray(tgt_labels)

    # Replicate PyTorch branch: single-logit -> prepend a zero "background" logit.
    if pred_logits.shape[-1] == 1:
        pred_logits = jnp.concatenate(
            [jnp.zeros_like(pred_logits), pred_logits], axis=-1)

    B, Q, C = pred_logits.shape
    T = tgt_boxes.shape[1]

    # ---- lane/sublane-aligned padded sizes ----------------------------------
    # Qp multiple of 16 (bf16 sublane packing for the class-cost matmul),
    # Tp multiple of 128 (lane-dense output stores, no vst.msk).
    Qp = _round_up(Q, 16)
    Tp = _round_up(T, 128)

    # ---- batch fusion sizing --------------------------------------------------
    # Count BlockSpec tiles (x2 for double buffering) plus the ~6 full QpxTp
    # f32 elementwise temporaries the kernel body materializes.
    per_b_bytes = (2 * (Qp * C * 4          # logits
                        + Qp * 8 * 4        # pred features
                        + 8 * Tp * 4        # target features
                        + C * Tp * 2        # one-hot (bf16)
                        + Qp * Tp * 4)      # output tile
                   + 6 * Qp * Tp * 4)       # live elementwise temporaries
    vmem_cap = _vmem_capacity_bytes()
    vmem_limit = max(32 * 1024 * 1024,
                     min(int(vmem_cap * 3 // 4), 96 * 1024 * 1024))
    budget = int(vmem_limit * 0.7)
    B_blk = _choose_batch_block(B, budget // max(per_b_bytes, 1))
    num_blocks = B // B_blk                   # B_blk divides B -> no batch padding

    # ---- host-side (XLA-fused) feature preparation ---------------------------
    wb = float(cost_bbox)  # assumed >= 0 (standard DETR); folded into cxcywh
    cx, cy, w, h = (pred_boxes[..., 0:1], pred_boxes[..., 1:2],
                    pred_boxes[..., 2:3], pred_boxes[..., 3:4])
    pred_feat = jnp.concatenate(
        [wb * cx, wb * cy, wb * w, wb * h,
         cx - 0.5 * w, cy - 0.5 * h, cx + 0.5 * w, cy + 0.5 * h],
        axis=-1)                                                 # [B, Q, 8]

    tcx, tcy, tw, th = (tgt_boxes[..., 0:1], tgt_boxes[..., 1:2],
                        tgt_boxes[..., 2:3], tgt_boxes[..., 3:4])
    tgt_feat = jnp.concatenate(
        [wb * tcx, wb * tcy, wb * tw, wb * th,
         tcx - 0.5 * tw, tcy - 0.5 * th, tcx + 0.5 * tw, tcy + 0.5 * th],
        axis=-1)                                                 # [B, T, 8]
    tgt_feat = jnp.transpose(tgt_feat, (0, 2, 1))                # [B, 8, T]

    onehot_T = jnp.transpose(
        jax.nn.one_hot(tgt_labels, C, dtype=jnp.bfloat16), (0, 2, 1))  # [B, C, T]

    # ---- pad Q/T; padded rows/cols are sliced away afterwards ---------------
    logits_p = _pad_to(pred_logits, (B, Qp, C))
    pred_feat_p = _pad_to(pred_feat, (B, Qp, 8))
    tgt_feat_p = _pad_to(tgt_feat, (B, 8, Tp))
    onehot_p = _pad_to(onehot_T, (B, C, Tp))

    kernel = _make_cost_kernel(cost_class, cost_giou)

    cost_padded = pl.pallas_call(
        kernel,
        out_shape=jax.ShapeDtypeStruct((B, Qp, Tp), jnp.float32),
        grid=(num_blocks,),
        in_specs=[
            pl.BlockSpec((B_blk, Qp, C), lambda b: (b, 0, 0)),
            pl.BlockSpec((B_blk, Qp, 8), lambda b: (b, 0, 0)),
            pl.BlockSpec((B_blk, 8, Tp), lambda b: (b, 0, 0)),
            pl.BlockSpec((B_blk, C, Tp), lambda b: (b, 0, 0)),
        ],
        out_specs=pl.BlockSpec((B_blk, Qp, Tp), lambda b: (b, 0, 0)),
        compiler_params=pltpu.CompilerParams(
            dimension_semantics=("parallel",),
            vmem_limit_bytes=vmem_limit),
    )(logits_p, pred_feat_p, tgt_feat_p, onehot_p)

    return cost_padded[:, :Q, :T]


def _linear_sum_assignment_small(C):
    """Optimal assignment for a small Q x T cost matrix (exhaustive search)."""
    # TODO(synk): scipy's Hungarian (linear_sum_assignment) is a sequential
    # host-side algorithm with no clean Pallas equivalent; use scipy on host
    # for real DETR sizes. The exhaustive search below is only for tiny demos.
    C = np.asarray(C)
    Q, T = C.shape
    transposed = False
    if T > Q:
        C = C.T
        Q, T = C.shape
        transposed = True
    best_cost = None
    best_perm = None
    for perm in itertools.permutations(range(Q), T):
        c = sum(C[perm[j], j] for j in range(T))
        if best_cost is None or c < best_cost:
            best_cost = c
            best_perm = perm
    rows = np.array(best_perm, dtype=np.int64)
    cols = np.arange(T, dtype=np.int64)
    order = np.argsort(rows)
    rows, cols = rows[order], cols[order]
    if transposed:
        rows, cols = cols, rows
        order = np.argsort(rows)
        rows, cols = rows[order], cols[order]
    return rows, cols


def hungarian_matcher(outputs, targets, cost_class=1.0, cost_bbox=1.0,
                      cost_giou=1.0):
    """Mirrors HungarianMatcher.forward for same-size targets per batch."""
    tgt_labels = jnp.stack([t["labels"] for t in targets], axis=0)   # [B, T]
    tgt_boxes = jnp.stack([t["boxes"] for t in targets], axis=0)     # [B, T, 4]
    C = compute_cost_matrices(outputs["pred_logits"], outputs["pred_boxes"],
                              tgt_labels, tgt_boxes,
                              cost_class, cost_bbox, cost_giou)
    C = jax.block_until_ready(C)
    C_host = np.asarray(C)
    indices = []
    for b in range(C_host.shape[0]):
        rows, cols = _linear_sum_assignment_small(C_host[b])
        indices.append((rows, cols))
    return indices, C


def _reference_cost(pred_logits, pred_boxes, tgt_labels, tgt_boxes,
                    wc=1.0, wb=1.0, wg=1.0):
    """Pure-numpy reference for the cost matrix (mirrors PyTorch math)."""
    pl_ = np.asarray(pred_logits, np.float32)
    if pl_.shape[-1] == 1:
        pl_ = np.concatenate([np.zeros_like(pl_), pl_], axis=-1)
    e = np.exp(pl_ - pl_.max(-1, keepdims=True))
    prob = e / e.sum(-1, keepdims=True)
    ob = np.asarray(pred_boxes, np.float32)
    tb = np.asarray(tgt_boxes, np.float32)
    tl = np.asarray(tgt_labels)
    B, Q, _ = ob.shape
    T = tb.shape[1]
    out = np.zeros((B, Q, T), np.float32)

    def to_xyxy(x):
        cx, cy, w, h = x[..., 0], x[..., 1], x[..., 2], x[..., 3]
        return np.stack([cx - 0.5 * w, cy - 0.5 * h, cx + 0.5 * w, cy + 0.5 * h], -1)

    for b in range(B):
        cc = -prob[b][:, tl[b]]
        cb = np.abs(ob[b][:, None, :] - tb[b][None, :, :]).sum(-1)
        o = to_xyxy(ob[b]); t = to_xyxy(tb[b])
        ix1 = np.maximum(o[:, None, 0], t[:, 0]); iy1 = np.maximum(o[:, None, 1], t[:, 1])
        ix2 = np.minimum(o[:, None, 2], t[:, 2]); iy2 = np.minimum(o[:, None, 3], t[:, 3])
        inter = np.clip(ix2 - ix1, 0, None) * np.clip(iy2 - iy1, 0, None)
        a1 = np.clip(o[:, 2] - o[:, 0], 0, None) * np.clip(o[:, 3] - o[:, 1], 0, None)
        a2 = np.clip(t[:, 2] - t[:, 0], 0, None) * np.clip(t[:, 3] - t[:, 1], 0, None)
        union = a1[:, None] + a2 - inter
        iou = inter / union
        cx1 = np.minimum(o[:, None, 0], t[:, 0]); cy1 = np.minimum(o[:, None, 1], t[:, 1])
        cx2 = np.maximum(o[:, None, 2], t[:, 2]); cy2 = np.maximum(o[:, None, 3], t[:, 3])
        ca = np.clip(cx2 - cx1, 0, None) * np.clip(cy2 - cy1, 0, None)
        giou = iou - (ca - union) / ca
        out[b] = wb * cb + wc * cc + wg * (-giou)
    return out


if __name__ == "__main__":
    key = jax.random.PRNGKey(0)
    B, Q, C, T = 2, 8, 4, 4
    k1, k2, k3, k4 = jax.random.split(key, 4)

    pred_logits = jax.random.normal(k1, (B, Q, C), dtype=jnp.float32)
    # Normalized cxcywh boxes in (0, 1) with small sizes so boxes stay valid.
    centers = jax.random.uniform(k2, (B, Q, 2), minval=0.2, maxval=0.8)
    sizes = jax.random.uniform(k3, (B, Q, 2), minval=0.05, maxval=0.3)
    pred_boxes = jnp.concatenate([centers, sizes], axis=-1)

    tk1, tk2, tk3 = jax.random.split(k4, 3)
    tgt_labels = jax.random.randint(tk1, (B, T), 0, C)
    t_centers = jax.random.uniform(tk2, (B, T, 2), minval=0.2, maxval=0.8)
    t_sizes = jax.random.uniform(tk3, (B, T, 2), minval=0.05, maxval=0.3)
    tgt_boxes = jnp.concatenate([t_centers, t_sizes], axis=-1)

    outputs = {"pred_logits": pred_logits, "pred_boxes": pred_boxes}
    targets = [{"labels": tgt_labels[b], "boxes": tgt_boxes[b]} for b in range(B)]

    indices, cost = hungarian_matcher(outputs, targets,
                                      cost_class=1.0, cost_bbox=1.0, cost_giou=1.0)
    cost = jax.block_until_ready(cost)

    # Correctness check of the Pallas cost matrix against a numpy reference.
    # Tolerance covers bf16 class-cost matmul and EUP approx reciprocals.
    ref = _reference_cost(pred_logits, pred_boxes, tgt_labels, tgt_boxes)
    np.testing.assert_allclose(np.asarray(cost), ref, rtol=2e-2, atol=2e-2)

    print("KERNEL_OK")
</pallas_src>

<mosaic_0001>
module attributes {stable_mosaic.version = 11 : i64} {
  func.func @kernel(%arg0: i32, %arg1: memref<1x16x4xf32, #tpu.memory_space<vmem>>, %arg2: memref<1x16x8xf32, #tpu.memory_space<vmem>>, %arg3: memref<1x8x128xf32, #tpu.memory_space<vmem>>, %arg4: memref<1x4x128xbf16, #tpu.memory_space<vmem>>, %arg5: memref<1x16x128xf32, #tpu.memory_space<vmem>>) attributes {dimension_semantics = [#tpu.dimension_semantics<parallel>], iteration_bounds = array<i64: 2>, scalar_prefetch = 0 : i64, scratch_operands = 0 : i64, tpu.core_type = #tpu.core_type<tc>, window_params = [{transform_indices = @transform_0, window_bounds = array<i64: 1, 16, 4>}, {transform_indices = @transform_1, window_bounds = array<i64: 1, 16, 8>}, {transform_indices = @transform_2, window_bounds = array<i64: 1, 8, 128>}, {transform_indices = @transform_3, window_bounds = array<i64: 1, 4, 128>}, {transform_indices = @transform_4, window_bounds = array<i64: 1, 16, 128>}]} {
    %c0 = arith.constant 0 : index
    %c0_0 = arith.constant 0 : index
    %c0_1 = arith.constant 0 : index
    %0 = vector.load %arg1[%c0, %c0_0, %c0_1] : memref<1x16x4xf32, #tpu.memory_space<vmem>>, vector<1x16x4xf32>
    %c0_2 = arith.constant 0 : index
    %c0_3 = arith.constant 0 : index
    %c0_4 = arith.constant 0 : index
    %1 = vector.load %arg2[%c0_2, %c0_3, %c0_4] : memref<1x16x8xf32, #tpu.memory_space<vmem>>, vector<1x16x8xf32>
    %c0_5 = arith.constant 0 : index
    %c0_6 = arith.constant 0 : index
    %c0_7 = arith.constant 0 : index
    %2 = vector.load %arg3[%c0_5, %c0_6, %c0_7] : memref<1x8x128xf32, #tpu.memory_space<vmem>>, vector<1x8x128xf32>
    %c0_8 = arith.constant 0 : index
    %c0_9 = arith.constant 0 : index
    %c0_10 = arith.constant 0 : index
    %3 = vector.load %arg4[%c0_8, %c0_9, %c0_10] : memref<1x4x128xbf16, #tpu.memory_space<vmem>>, vector<1x4x128xbf16>
    %cst = arith.constant dense<0xFF800000> : vector<1x16xf32>
    %4 = vector.multi_reduction <maximumf>, %0, %cst [2] : vector<1x16x4xf32> to vector<1x16xf32>
    %5 = vector.shape_cast %4 : vector<1x16xf32> to vector<1x16x1xf32>
    %6 = vector.broadcast %5 : vector<1x16x1xf32> to vector<1x16x4xf32>
    %7 = arith.subf %0, %6 : vector<1x16x4xf32>
    %8 = math.exp %7 : vector<1x16x4xf32>
    %cst_11 = arith.constant dense<0.000000e+00> : vector<1x16xf32>
    %9 = vector.multi_reduction <add>, %8, %cst_11 [2] : vector<1x16x4xf32> to vector<1x16xf32>
    %10 = vector.shape_cast %9 : vector<1x16xf32> to vector<1x16x1xf32>
    %cst_12 = arith.constant -1.000000e+00 : f32
    %11 = vector.broadcast %cst_12 : f32 to vector<1x16x1xf32>
    %12 = arith.divf %11, %10 : vector<1x16x1xf32>
    %13 = vector.broadcast %12 : vector<1x16x1xf32> to vector<1x16x4xf32>
    %14 = arith.mulf %8, %13 : vector<1x16x4xf32>
    %15 = arith.truncf %14 : vector<1x16x4xf32> to vector<1x16x4xbf16>
    "tpu.trace_start"() <{level = 10 : i32, message = "bqc,bct->bqt"}> : () -> ()
    %cst_13 = arith.constant dense<0.000000e+00> : vector<1x16x128xf32>
    %16 = tpu.matmul %15, %3, %cst_13 {dimension_numbers = #tpu.dot_dimension_numbers<[2], [1], [1], [2], [0, 0, 0, 1, 1, 2], [0], [0]>} : vector<1x16x4xbf16>, vector<1x4x128xbf16>, vector<1x16x128xf32> -> vector<1x16x128xf32>
    "tpu.trace_stop"() : () -> ()
    %17 = vector.extract_strided_slice %1 {offsets = [0, 0, 0], sizes = [1, 16, 1], strides = [1, 1, 1]} : vector<1x16x8xf32> to vector<1x16x1xf32>
    %18 = vector.extract_strided_slice %1 {offsets = [0, 0, 1], sizes = [1, 16, 1], strides = [1, 1, 1]} : vector<1x16x8xf32> to vector<1x16x1xf32>
    %19 = vector.extract_strided_slice %1 {offsets = [0, 0, 2], sizes = [1, 16, 1], strides = [1, 1, 1]} : vector<1x16x8xf32> to vector<1x16x1xf32>
    %20 = vector.extract_strided_slice %1 {offsets = [0, 0, 3], sizes = [1, 16, 1], strides = [1, 1, 1]} : vector<1x16x8xf32> to vector<1x16x1xf32>
    %21 = vector.extract_strided_slice %1 {offsets = [0, 0, 4], sizes = [1, 16, 1], strides = [1, 1, 1]} : vector<1x16x8xf32> to vector<1x16x1xf32>
    %22 = vector.extract_strided_slice %1 {offsets = [0, 0, 5], sizes = [1, 16, 1], strides = [1, 1, 1]} : vector<1x16x8xf32> to vector<1x16x1xf32>
    %23 = vector.extract_strided_slice %1 {offsets = [0, 0, 6], sizes = [1, 16, 1], strides = [1, 1, 1]} : vector<1x16x8xf32> to vector<1x16x1xf32>
    %24 = vector.extract_strided_slice %1 {offsets = [0, 0, 7], sizes = [1, 16, 1], strides = [1, 1, 1]} : vector<1x16x8xf32> to vector<1x16x1xf32>
    %25 = vector.extract_strided_slice %2 {offsets = [0, 0, 0], sizes = [1, 1, 128], strides = [1, 1, 1]} : vector<1x8x128xf32> to vector<1x1x128xf32>
    %26 = vector.extract_strided_slice %2 {offsets = [0, 1, 0], sizes = [1, 1, 128], strides = [1, 1, 1]} : vector<1x8x128xf32> to vector<1x1x128xf32>
    %27 = vector.extract_strided_slice %2 {offsets = [0, 2, 0], sizes = [1, 1, 128], strides = [1, 1, 1]} : vector<1x8x128xf32> to vector<1x1x128xf32>
    %28 = vector.extract_strided_slice %2 {offsets = [0, 3, 0], sizes = [1, 1, 128], strides = [1, 1, 1]} : vector<1x8x128xf32> to vector<1x1x128xf32>
    %29 = vector.extract_strided_slice %2 {offsets = [0, 4, 0], sizes = [1, 1, 128], strides = [1, 1, 1]} : vector<1x8x128xf32> to vector<1x1x128xf32>
    %30 = vector.extract_strided_slice %2 {offsets = [0, 5, 0], sizes = [1, 1, 128], strides = [1, 1, 1]} : vector<1x8x128xf32> to vector<1x1x128xf32>
    %31 = vector.extract_strided_slice %2 {offsets = [0, 6, 0], sizes = [1, 1, 128], strides = [1, 1, 1]} : vector<1x8x128xf32> to vector<1x1x128xf32>
    %32 = vector.extract_strided_slice %2 {offsets = [0, 7, 0], sizes = [1, 1, 128], strides = [1, 1, 1]} : vector<1x8x128xf32> to vector<1x1x128xf32>
    %33 = vector.broadcast %17 : vector<1x16x1xf32> to vector<1x16x128xf32>
    %34 = vector.broadcast %25 : vector<1x1x128xf32> to vector<1x16x128xf32>
    %35 = arith.subf %33, %34 : vector<1x16x128xf32>
    %36 = math.absf %35 : vector<1x16x128xf32>
    %37 = vector.broadcast %18 : vector<1x16x1xf32> to vector<1x16x128xf32>
    %38 = vector.broadcast %26 : vector<1x1x128xf32> to vector<1x16x128xf32>
    %39 = arith.subf %37, %38 : vector<1x16x128xf32>
    %40 = math.absf %39 : vector<1x16x128xf32>
    %41 = arith.addf %36, %40 : vector<1x16x128xf32>
    %42 = vector.broadcast %19 : vector<1x16x1xf32> to vector<1x16x128xf32>
    %43 = vector.broadcast %27 : vector<1x1x128xf32> to vector<1x16x128xf32>
    %44 = arith.subf %42, %43 : vector<1x16x128xf32>
    %45 = math.absf %44 : vector<1x16x128xf32>
    %46 = arith.addf %41, %45 : vector<1x16x128xf32>
    %47 = vector.broadcast %20 : vector<1x16x1xf32> to vector<1x16x128xf32>
    %48 = vector.broadcast %28 : vector<1x1x128xf32> to vector<1x16x128xf32>
    %49 = arith.subf %47, %48 : vector<1x16x128xf32>
    %50 = math.absf %49 : vector<1x16x128xf32>
    %51 = arith.addf %46, %50 : vector<1x16x128xf32>
    %52 = arith.addf %51, %16 : vector<1x16x128xf32>
    %53 = vector.broadcast %23 : vector<1x16x1xf32> to vector<1x16x128xf32>
    %54 = vector.broadcast %31 : vector<1x1x128xf32> to vector<1x16x128xf32>
    %55 = arith.minimumf %53, %54 : vector<1x16x128xf32>
    %56 = vector.broadcast %21 : vector<1x16x1xf32> to vector<1x16x128xf32>
    %57 = vector.broadcast %29 : vector<1x1x128xf32> to vector<1x16x128xf32>
    %58 = arith.maximumf %56, %57 : vector<1x16x128xf32>
    %59 = arith.subf %55, %58 : vector<1x16x128xf32>
    %cst_14 = arith.constant 0.000000e+00 : f32
    %60 = vector.broadcast %cst_14 : f32 to vector<1x16x128xf32>
    %61 = arith.maximumf %59, %60 : vector<1x16x128xf32>
    %62 = vector.broadcast %24 : vector<1x16x1xf32> to vector<1x16x128xf32>
    %63 = vector.broadcast %32 : vector<1x1x128xf32> to vector<1x16x128xf32>
    %64 = arith.minimumf %62, %63 : vector<1x16x128xf32>
    %65 = vector.broadcast %22 : vector<1x16x1xf32> to vector<1x16x128xf32>
    %66 = vector.broadcast %30 : vector<1x1x128xf32> to vector<1x16x128xf32>
    %67 = arith.maximumf %65, %66 : vector<1x16x128xf32>
    %68 = arith.subf %64, %67 : vector<1x16x128xf32>
    %cst_15 = arith.constant 0.000000e+00 : f32
    %69 = vector.broadcast %cst_15 : f32 to vector<1x16x128xf32>
    %70 = arith.maximumf %68, %69 : vector<1x16x128xf32>
    %71 = arith.mulf %61, %70 : vector<1x16x128xf32>
    %72 = arith.subf %23, %21 : vector<1x16x1xf32>
    %cst_16 = arith.constant 0.000000e+00 : f32
    %73 = vector.broadcast %cst_16 : f32 to vector<1x16x1xf32>
    %74 = arith.maximumf %72, %73 : vector<1x16x1xf32>
    %75 = arith.subf %24, %22 : vector<1x16x1xf32>
    %cst_17 = arith.constant 0.000000e+00 : f32
    %76 = vector.broadcast %cst_17 : f32 to vector<1x16x1xf32>
    %77 = arith.maximumf %75, %76 : vector<1x16x1xf32>
    %78 = arith.mulf %74, %77 : vector<1x16x1xf32>
    %79 = arith.subf %31, %29 : vector<1x1x128xf32>
    %cst_18 = arith.constant 0.000000e+00 : f32
    %80 = vector.broadcast %cst_18 : f32 to vector<1x1x128xf32>
    %81 = arith.maximumf %79, %80 : vector<1x1x128xf32>
    %82 = arith.subf %32, %30 : vector<1x1x128xf32>
    %cst_19 = arith.constant 0.000000e+00 : f32
    %83 = vector.broadcast %cst_19 : f32 to vector<1x1x128xf32>
    %84 = arith.maximumf %82, %83 : vector<1x1x128xf32>
    %85 = arith.mulf %81, %84 : vector<1x1x128xf32>
    %86 = vector.broadcast %78 : vector<1x16x1xf32> to vector<1x16x128xf32>
    %87 = vector.broadcast %85 : vector<1x1x128xf32> to vector<1x16x128xf32>
    %88 = arith.addf %86, %87 : vector<1x16x128xf32>
    %89 = arith.subf %88, %71 : vector<1x16x128xf32>
    %cst_20 = arith.constant 9.99999996E-13 : f32
    %90 = vector.broadcast %cst_20 : f32 to vector<1x16x128xf32>
    %91 = arith.maximumf %89, %90 : vector<1x16x128xf32>
    %92 = tpu.reciprocal %91 {approx = true} : vector<1x16x128xf32> -> vector<1x16x128xf32>
    %93 = arith.mulf %71, %92 : vector<1x16x128xf32>
    %cst_21 = arith.constant 1.000000e+00 : f32
    %94 = vector.broadcast %cst_21 : f32 to vector<1x16x128xf32>
    %95 = arith.mulf %94, %93 : vector<1x16x128xf32>
    %96 = arith.subf %52, %95 : vector<1x16x128xf32>
    %97 = vector.broadcast %23 : vector<1x16x1xf32> to vector<1x16x128xf32>
    %98 = vector.broadcast %31 : vector<1x1x128xf32> to vector<1x16x128xf32>
    %99 = arith.maximumf %97, %98 : vector<1x16x128xf32>
    %100 = vector.broadcast %21 : vector<1x16x1xf32> to vector<1x16x128xf32>
    %101 = vector.broadcast %29 : vector<1x1x128xf32> to vector<1x16x128xf32>
    %102 = arith.minimumf %100, %101 : vector<1x16x128xf32>
    %103 = arith.subf %99, %102 : vector<1x16x128xf32>
    %cst_22 = arith.constant 0.000000e+00 : f32
    %104 = vector.broadcast %cst_22 : f32 to vector<1x16x128xf32>
    %105 = arith.maximumf %103, %104 : vector<1x16x128xf32>
    %106 = vector.broadcast %24 : vector<1x16x1xf32> to vector<1x16x128xf32>
    %107 = vector.broadcast %32 : vector<1x1x128xf32> to vector<1x16x128xf32>
    %108 = arith.maximumf %106, %107 : vector<1x16x128xf32>
    %109 = vector.broadcast %22 : vector<1x16x1xf32> to vector<1x16x128xf32>
    %110 = vector.broadcast %30 : vector<1x1x128xf32> to vector<1x16x128xf32>
    %111 = arith.minimumf %109, %110 : vector<1x16x128xf32>
    %112 = arith.subf %108, %111 : vector<1x16x128xf32>
    %cst_23 = arith.constant 0.000000e+00 : f32
    %113 = vector.broadcast %cst_23 : f32 to vector<1x16x128xf32>
    %114 = arith.maximumf %112, %113 : vector<1x16x128xf32>
    %115 = arith.mulf %105, %114 : vector<1x16x128xf32>
    %cst_24 = arith.constant 9.99999996E-13 : f32
    %116 = vector.broadcast %cst_24 : f32 to vector<1x16x128xf32>
    %117 = arith.maximumf %115, %116 : vector<1x16x128xf32>
    %118 = tpu.reciprocal %117 {approx = true} : vector<1x16x128xf32> -> vector<1x16x128xf32>
    %119 = arith.mulf %89, %118 : vector<1x16x128xf32>
    %cst_25 = arith.constant 1.000000e+00 : f32
    %120 = vector.broadcast %cst_25 : f32 to vector<1x16x128xf32>
    %121 = arith.mulf %120, %119 : vector<1x16x128xf32>
    %122 = arith.subf %96, %121 : vector<1x16x128xf32>
    %cst_26 = arith.constant 1.000000e+00 : f32
    %123 = vector.broadcast %cst_26 : f32 to vector<1x16x128xf32>
    %124 = arith.addf %122, %123 : vector<1x16x128xf32>
    %c0_27 = arith.constant 0 : index
    %c0_28 = arith.constant 0 : index
    %c0_29 = arith.constant 0 : index
    %125 = vector.load %arg5[%c0_27, %c0_28, %c0_29] : memref<1x16x128xf32, #tpu.memory_space<vmem>>, vector<1x16x128xf32>
    tpu.vector_store %arg5[%c0_27, %c0_28, %c0_29], %124 {strides = array<i32>} : memref<1x16x128xf32, #tpu.memory_space<vmem>>, vector<1x16x128xf32>,
    return
  }
  func.func @transform_0(%arg0: i32) -> (i32, i32, i32) {
    %c0_i32 = arith.constant 0 : i32
    %c0_i32_0 = arith.constant 0 : i32
    %c0_i32_1 = arith.constant 0 : i32
    return %arg0, %c0_i32, %c0_i32_0 : i32, i32, i32
  }
  func.func @transform_1(%arg0: i32) -> (i32, i32, i32) {
    %c0_i32 = arith.constant 0 : i32
    %c0_i32_0 = arith.constant 0 : i32
    %c0_i32_1 = arith.constant 0 : i32
    return %arg0, %c0_i32, %c0_i32_0 : i32, i32, i32
  }
  func.func @transform_2(%arg0: i32) -> (i32, i32, i32) {
    %c0_i32 = arith.constant 0 : i32
    %c0_i32_0 = arith.constant 0 : i32
    %c0_i32_1 = arith.constant 0 : i32
    return %arg0, %c0_i32, %c0_i32_0 : i32, i32, i32
  }
  func.func @transform_3(%arg0: i32) -> (i32, i32, i32) {
    %c0_i32 = arith.constant 0 : i32
    %c0_i32_0 = arith.constant 0 : i32
    %c0_i32_1 = arith.constant 0 : i32
    return %arg0, %c0_i32, %c0_i32_0 : i32, i32, i32
  }
  func.func @transform_4(%arg0: i32) -> (i32, i32, i32) {
    %c0_i32 = arith.constant 0 : i32
    %c0_i32_0 = arith.constant 0 : i32
    %c0_i32_1 = arith.constant 0 : i32
    return %arg0, %c0_i32, %c0_i32_0 : i32, i32, i32
  }
}

</mosaic_0001>

<bundles_post_ra>
// kernel: tpu_custom_call.1
= control target key start
LH: loop header
LB: loop body
LE: loop exit
PB: predicated region body
PF: predicated region fallthrough
CT: control target
= control target key end

     0   :  { %9 = vsyncpa [#allocation3], 0  ;;  %s1076_s0 = inlined_call_operand.vmem [shape: f32[2,16,4], index: 0, kind: input, shape index: {}]   ;;  %s1077_s1 = inlined_call_operand.vmem [shape: f32[2,16,8], index: 1, kind: input, shape index: {}]   ;;  %s1078_s2 = inlined_call_operand.vmem [shape: f32[2,8,128], index: 2, kind: input, shape index: {}]   ;;  %s1079_s3 = inlined_call_operand.vmem [shape: bf16[2,4,128], index: 3, kind: input, shape index: {}]   ;;  %s1080_s4 = inlined_call_operand.hbm [shape: f32[2,16,128], index: 4, kind: output, shape index: {}]  }
   0x1   :  { %11 = vsyncpa [#allocation3 + $0x1], 0  ;;  %s884_s15 = smov 0   ;;  %s886_s16 = smov 0  }
   0x2   :  { %s888_s17 = smov 0   ;;  %s890_s18 = smov 0  }
   0x3 LB: > { %s905_s19 = sadd.s32 4294967295, %s842_s18   ;;  %s668_s20 = sadd.s32 4294967294, %s842_s18   ;;  %s842_s18 = sphi %s890_s18, %s1086_s18   ;;  %s838_s17 = sphi %s888_s17, %s1085_s17   ;;  %s834_s16 = sphi %s886_s16, %s1084_s16   ;;  %s830_s15 = sphi %s884_s15, %s1083_s15  }
   0x4   : > { %s909_s21 = sadd.s32 1, %s842_s18   ;;  %s128_s22 = sadd.s32 1, %s838_s17 }
   0x5   : > { %s125_s23 = ssub.s32 %s842_s18, %s909_s21  ;;  %p138_p0 = scmp.ne.s32.totalorder %s838_s17, %s834_s16 }
   0x6   : > { %p126_p1 = scmp.eq.s32.totalorder %s125_s23, 0  ;;  %p139_p2 = scmp.eq.s32.totalorder %s905_s19, 1 }
   0x7   : > { %p144_p3 = scmp.ne.s32.totalorder %s834_s16, %s830_s15  ;;  %p145_p4 = scmp.eq.s32.totalorder %s668_s20, 1 }
   0x8   : > { %s920_s24 = scalar_select %p126_p1, %s838_s17, %s128_s22  }
   0x9   : > { %p922_p5 = por %p139_p2, %p138_p0  ;;  %p926_p6 = por %p145_p4, %p144_p3 }
   0xa   : > { %p671_p7 = scmp.ge.s32.totalorder %s842_s18, 1  ;;  %p193_p8 = scmp.lt.s32.totalorder %s842_s18, 3 }
   0xc   : > { %p194_p9 = pnand %p671_p7, %p193_p8 }
   0xd   : > { %p232_p10 = scmp.lt.s32.totalorder (!%p194_p9), %s905_s19, 1  ;;  %vm257_vm0 = vcmask (!%p194_p9), 31744   ;;  %s844_s9 = smov (!%p194_p9), 2   ;;  %v846_v19 = vmov (!%p194_p9), 6   ;;  %vm286_vm1 = vcmask (!%p194_p9), 1041408   ;;  %v847_v21 = vmov (!%p194_p9), 0.0  }
   0xe   : > { %197 = sbr.rel (%p194_p9) target bundleno = 625 (0x271), region = 36  ;;  %s845_s10 = smov (!%p194_p9), 127   ;;  %749 = vset.pattern.permute.xlu1 (!%p194_p9), %v846_v19  ;;  %690 = vmatprep.subr.bf16.mxu0 (!%p194_p9), %v847_v21  ;;  %vm848_vm2 = vmmov (!%p194_p9), 0   ;;  %v849_v23 = vmov (!%p194_p9), 4   ;;  %v850_v24 = vmov (!%p194_p9), 5   ;;  %v851_v37 = vmov (!%p194_p9), 7  }
   0xf   : > { %692 = vmatprep.mubr.msk.bf16.mxu0 (!%p194_p9), %vm848_vm2, %v847_v21  ;;  %751 = vset.pattern.permute.xlu0 (!%p194_p9), %v849_v23  ;;  %v852_v38 = vmov (!%p194_p9), 0   ;;  %v853_v41 = vmov (!%p194_p9), 1   ;;  %v854_v42 = vmov (!%p194_p9), 2   ;;  %v855_v43 = vmov (!%p194_p9), 3   ;;  %s687_s30 = sshll.u32 (!%p194_p9), %s905_s19, 8 }
  0x10   : > { %v341_v49 = vlaneseq (!%p194_p9) }
  0x12   : > { %v989_v54 = vshrl.u32 (!%p194_p9), %v341_v49, 7 }
  0x14   : > { %v461_v57 = vsub.s32 (!%p194_p9), 5, %v989_v54  ;;  %v415_v59 = vsub.s32 (!%p194_p9), 6, %v989_v54  ;;  %v429_v60 = vsub.s32 (!%p194_p9), 4, %v989_v54  ;;  %v447_v61 = vsub.s32 (!%p194_p9), 7, %v989_v54 }
  0x15   : > { %s934_s27 = scalar_select %p232_p10, %s905_s19, 1 }
  0x17   : > { %s685_s28 = sshll.u32 %s934_s27, 4  ;;  %s678_s11 = sshll.u32 %s934_s27, 1 }
  0x18   : > { %s236_s5 = scalar_lea.vmem %s1076_s0, %s685_s28  ;;  %s241_s8 = scalar_lea.vmem %s1077_s1, %s685_s28 }
  0x19   : > { %v251_v0 = vld [vmem:[%s236_s5] sm:$0xff]  ;;  %v252_v2 = vld [vmem:[%s236_s5 + $0x8] sm:$0xff]  ;;  %s249_s14 = scalar_lea.vmem %s1079_s3, %s678_s11  ;;  %s677_s20 = sshll.u32 %s934_s27, 3 }
  0x1a   : > { %v258_v1 = vsel %vm257_vm0, %v251_v0, -inf  ;;  %v261_v3 = vsel %vm257_vm0, %v252_v2, -inf  ;;  %v945_v4 = vld [vmem:[%s241_s8] sm:$0xff]  ;;  %v951_v17 = vld [vmem:[%s241_s8 + $0x8] sm:$0xff]  ;;  %s245_s28 = scalar_lea.vmem %s1078_s2, %s677_s20  ;;  %s229_s27 = sand.u32 1, %s834_s16  }
  0x1b   : > { %259 = vmax.xlane.f32.xlu0 %v258_v1  ;;  %v256_v20 = vld [vmem:[%s249_s14] sm:$0x3]  ;;  %s672_s29 = sshll.u32 %s229_s27, 4  ;;  %s856_s11 = smov [#allocation2]  }
  0x1c   : > { %v288_v22 = vsel %vm286_vm1, %v256_v20, 0  ;;  %v986_v51 = vld [vmem:[%s245_s28] sm:$0xff]  ;;  %s231_s5 = scalar_lea.vmem [#allocation2], %s672_s29  ;;  %s784_s12 = sshll.u32 %s856_s11, 4  ;;  %s785_s12 = int_to_ptr.vmem [resolvable:$false] %s784_s12 }
  0x1d   : > { %691 = vmatpush3.bf16.msra.mxu0 %v288_v22  ;;  %v492_v53 = vrot.slane %v986_v51, 6  ;;  %v462_v63 = vrot.slane %v986_v51, %v461_v57  ;;  %v395_v57 = vsub.s32 3, %v989_v54  ;;  %s570_s6 = sshll.u32 %s231_s5, 4  ;;  %s786_s13 = scalar_lea.vmem %s785_s12, 512  ;;  %s1033_s6 = int_to_ptr.vmem [resolvable:$true] %s570_s6 }
  0x1e   : > { %s780_s19 = scalar_lea.vmem %s1033_s6, 256  ;;  %p787_p0 = scmp.lt.s32.totalorder %s1033_s6, %s785_s12 }
  0x1f   : > { %262 = vmax.xlane.f32.xlu0 %v261_v3  ;;  %v494_v56 = vsub.f32 %v986_v51, %v492_v53  ;;  %v430_v3 = vrot.slane %v986_v51, %v429_v60  ;;  %p781_p11 = scmp.ne.s32.totalorder %s1033_s6, %s780_s19  ;;  %p788_p1 = scmp.lt.s32.totalorder %s786_s13, %s780_s19 }
  0x21   : > { %v495_v62 = vmax.f32 %v494_v56, 0.0  ;;  %v377_v56 = vsub.s32 2, %v989_v54  ;;  %p782_p12 = pnand %p781_p11, %p922_p5  ;;  %p789_p2 = por %p788_p1, %p787_p0 }
  0x23   : > { %p783_p13 = pneg %p782_p12 }
  0x25   : > { %p790_p3 = pnand %p789_p2, %p783_p13 }
  0x35   : > { %471 = vrot.lane.b32.xlu0 %v945_v4, %s844_s9 }
  0x39   : > { %424 = vperm.xlu0 %751, %v951_v17  }
  0x3d   : > { %753 = vset.pattern.permute.xlu0 %v850_v24 }
  0x3e   : > { %452 = vperm.xlu0 %753, %v945_v4  }
  0x42   : > { %754 = vset.pattern.permute.xlu0 %v846_v19 }
  0x43   : > { %406 = vperm.xlu0 %754, %v945_v4  }
  0xa8   : > { %v260_v5 = vpop.xlane.xlu0 %259 }
  0xa9   : > { %v264_v6 = vsub.f32 %v251_v0, %v260_v5 }
  0xab   : > { %v266_v7 = vmul.f32 1.442695, %v264_v6 }
  0xac   : > { %v263_v8 = vpop.xlane.xlu0 %262 }
  0xad   : > { %764 = vpow2.f32 %v266_v7  ;;  %v265_v9 = vsub.f32 %v252_v2, %v263_v8  ;;  %v416_v2 = vrot.slane %v986_v51, %v415_v59 }
  0xaf   : > { %v268_v10 = vmul.f32 1.442695, %v265_v9 }
  0xb0   : > { %v472_v15 = vpop.permute.xlu0 %471 }
  0xb1   : > { %766 = vpow2.f32 %v268_v10  ;;  %v477_v16 = vsub.f32 %v945_v4, %v472_v15 }
  0xb3   : > { %v479_v18 = vmax.f32 %v477_v16, 0.0 }
  0xb7   : > { %v765_v11 = vpop.eup %764 }
  0xb8   : > { %v270_v12 = vsel %vm257_vm0, %v765_v11, 0.0  ;;  %v425_v52 = vpop.permute.xlu0 %424 }
  0xb9   : > { %271 = vadd.xlane.f32.xlu1 %v270_v12  ;;  %v497_v12 = vrot.slane %v495_v62, 1 }
  0xbb   : > { %v767_v13 = vpop.eup %766 }
  0xbc   : > { %v273_v14 = vsel %vm257_vm0, %v767_v13, 0.0 }
  0xbd   : > { %274 = vadd.xlane.f32.xlu1 %v273_v14  ;;  %v453_v58 = vpop.permute.xlu0 %452 }
  0xbe   : > { %v463_v6 = vmax.f32 %v453_v58, %v462_v63 }
  0xc2   : > { %v407_v7 = vpop.permute.xlu0 %406 }
  0xc3   : > { %v526_v21 = vmax.f32 %v407_v7, %v416_v2 }
  0xce   : > { %473 = vrot.lane.b32.xlu1 %v951_v17, %s844_s9  ;;  %s1031_s9 = scalar_lea.hbm %s1080_s4, %s687_s30 }
  0xd2   : > { %483 = vrot.lane.b32.xlu1 %v479_v18, %s845_s10 }
 0x146   : > { %v272_v25 = vpop.xlane.xlu1 %271 }
 0x147   : > { %768 = vrcp.f32 %v272_v25 }
 0x14a   : > { %v275_v26 = vpop.xlane.xlu1 %274 }
 0x14b   : > { %770 = vrcp.f32 %v275_v26  ;;  %v432_v26 = vmax.f32 %v425_v52, %v430_v3 }
 0x14e   : > { %v474_v27 = vpop.permute.xlu1 %473 }
 0x14f   : > { %v478_v28 = vsub.f32 %v951_v17, %v474_v27 }
 0x151   : > { %v769_v29 = vpop.eup %768  ;;  %v480_v30 = vmax.f32 %v478_v28, 0.0 }
 0x152   : > { %v277_v31 = vmul.f32 -1.0, %v769_v29  ;;  %v484_v39 = vpop.permute.xlu1 %483 }
 0x153   : > { %485 = vrot.lane.b32.xlu1 %v480_v30, %s845_s10  ;;  %v489_v40 = vmul.f32 %v484_v39, %v479_v18  ;;  %s1035_s10 = scalar_lea.sflag [#allocation3], %s229_s27 }
 0x154   : > { %v280_v34 = vmul.f32 %v765_v11, %v277_v31  ;;  %v417_v11 = vmin.f32 %v407_v7, %v416_v2 }
 0x155   : > { %v771_v32 = vpop.eup %770 }
 0x156   : > { %v279_v33 = vmul.f32 -1.0, %v771_v32 }
 0x157   : > { %410 = vperm.xlu1 %749, %v951_v17  }
 0x158   : > { %v281_v35 = vmul.f32 %v767_v13, %v279_v33  ;;  %v529_v33 = vmin.f32 %v425_v52, %v430_v3 }
 0x15a   : > { %v282_v36 = vpack.c.bf16 %v281_v35, %v280_v34 }
 0x15b   : > { %750 = vset.pattern.permute.xlu1 %v849_v23 }
 0x15c   : > { %693 = vmatmul.mubr.msk.bf16.vlgmr.msra.gmra.mrb[0].mxu0 %vm257_vm0, %v282_v36  ;;  %420 = vperm.xlu1 %750, %v945_v4  }
 0x160   : > { %752 = vset.pattern.permute.xlu1 %v851_v37 }
 0x161   : > { %438 = vperm.xlu1 %752, %v945_v4  }
 0x165   : > { %442 = vperm.xlu1 %752, %v951_v17  }
 0x169   : > { %755 = vset.pattern.permute.xlu1 %v850_v24 }
 0x16a   : > { %456 = vperm.xlu1 %755, %v951_v17  }
 0x16e   : > { %756 = vset.pattern.permute.xlu1 %v852_v38 }
 0x16f   : > { %333 = vperm.xlu1 %756, %v945_v4  }
 0x173   : > { %338 = vperm.xlu1 %756, %v951_v17  }
 0x177   : > { %757 = vset.pattern.permute.xlu1 %v846_v19 }
 0x178   : > { %502 = vperm.xlu1 %757, %v489_v40  }
 0x17c   : > { %759 = vset.pattern.permute.xlu1 %v853_v41 }
 0x17d   : > { %354 = vperm.xlu1 %759, %v951_v17  }
 0x181   : > { %760 = vset.pattern.permute.xlu1 %v854_v42 }
 0x182   : > { %368 = vperm.xlu1 %760, %v945_v4  }
 0x186   : > { %762 = vset.pattern.permute.xlu1 %v855_v43 }
 0x187   : > { %386 = vperm.xlu1 %762, %v945_v4  }
 0x18b   : > { %390 = vperm.xlu1 %762, %v951_v17  }
 0x1c5   : > { %v486_v44 = vpop.permute.xlu1 %485 }
 0x1c6   : > { %v490_v45 = vmul.f32 %v486_v44, %v480_v30 }
 0x1c8   : > { %507 = vperm.xlu0 %754, %v490_v45  }
 0x1cc   : > { %758 = vset.pattern.permute.xlu0 %v853_v41 }
 0x1cd   : > { %350 = vperm.xlu0 %758, %v945_v4   ;;  %v448_v4 = vrot.slane %v986_v51, %v447_v61 }
 0x1d1   : > { %761 = vset.pattern.permute.xlu0 %v854_v42 }
 0x1d2   : > { %372 = vperm.xlu0 %761, %v951_v17   ;;  %v499_v17 = vmul.f32 %v497_v12, %v495_v62 }
 0x1d4   : > { %v513_v24 = vrot.slane %v499_v17, %v415_v59 }
 0x1d6   : > { %763 = vset.pattern.permute.xlu0 %v846_v19  ;;  %v980_v46 = vpop.permute.xlu1 %410  ;;  %v536_v19 = vmin.f32 %v453_v58, %v462_v63 }
 0x1d7   : > { %v418_v25 = vmin.f32 %v980_v46, %v416_v2  ;;  %v527_v32 = vmax.f32 %v980_v46, %v416_v2 }
 0x1d9   : > { %v434_v39 = vsub.f32 %v418_v25, %v432_v26  ;;  %v531_v43 = vsub.f32 %v527_v32, %v529_v33 }
 0x1db   : > { %v421_v47 = vpop.permute.xlu1 %420  ;;  %v436_v49 = vmax.f32 %v434_v39, 0.0  ;;  %v533_v53 = vmax.f32 %v531_v43, 0.0 }
 0x1dc   : > { %v431_v9 = vmax.f32 %v421_v47, %v430_v3  ;;  %v528_v18 = vmin.f32 %v421_v47, %v430_v3  ;;  %v343_v47 = vsub.s32 0, %v989_v54 }
 0x1de   : > { %v433_v16 = vsub.f32 %v417_v11, %v431_v9  ;;  %v530_v29 = vsub.f32 %v526_v21, %v528_v18  ;;  %v344_v59 = vrot.slane %v986_v51, %v343_v47 }
 0x1e0   : > { %v439_v48 = vpop.permute.xlu1 %438  ;;  %v435_v23 = vmax.f32 %v433_v16, 0.0  ;;  %v532_v41 = vmax.f32 %v530_v29, 0.0 }
 0x1e1   : > { %v449_v10 = vmin.f32 %v439_v48, %v448_v4  ;;  %v534_v20 = vmax.f32 %v439_v48, %v448_v4 }
 0x1e3   : > { %v465_v15 = vsub.f32 %v449_v10, %v463_v6  ;;  %v538_v28 = vsub.f32 %v534_v20, %v536_v19 }
 0x1e4   : > { %v443_v50 = vpop.permute.xlu1 %442 }
 0x1e5   : > { %v467_v22 = vmax.f32 %v465_v15, 0.0  ;;  %v450_v30 = vmin.f32 %v443_v50, %v448_v4  ;;  %v535_v34 = vmax.f32 %v443_v50, %v448_v4  ;;  %v540_v40 = vmax.f32 %v538_v28, 0.0 }
 0x1e6   : > { %v359_v50 = vsub.s32 1, %v989_v54  ;;  %v378_v4 = vrot.slane %v986_v51, %v377_v56 }
 0x1e7   : > { %v1010_v36 = vmul.f32 %v467_v22, %v435_v23  ;;  %v542_v46 = vmul.f32 %v540_v40, %v532_v41 }
 0x1e8   : > { %v360_v62 = vrot.slane %v986_v51, %v359_v50 }
 0x1e9   : > { %v457_v55 = vpop.permute.xlu1 %456  ;;  %v544_v61 = vmax.f32 %v542_v46, 1e-12 }
 0x1ea   : > { %v464_v31 = vmax.f32 %v457_v55, %v462_v63  ;;  %v537_v35 = vmin.f32 %v457_v55, %v462_v63 }
 0x1ec   : > { %v466_v42 = vsub.f32 %v450_v30, %v464_v31  ;;  %v539_v44 = vsub.f32 %v535_v34, %v537_v35 }
 0x1ee   : > { %v997_v0 = vpop.permute.xlu1 %333  ;;  %v468_v52 = vmax.f32 %v466_v42, 0.0  ;;  %v541_v55 = vmax.f32 %v539_v44, 0.0 }
 0x1ef   : > { %v345_v9 = vsub.f32 %v997_v0, %v344_v59 }
 0x1f0   : > { %v470_v63 = vmul.f32 %v468_v52, %v436_v49  ;;  %v543_v3 = vmul.f32 %v541_v55, %v533_v53 }
 0x1f1   : > { %v347_v18 = vand.u32 2147483647, %v345_v9 }
 0x1f2   : > { %v1006_v14 = vpop.permute.xlu1 %338 }
 0x1f3   : > { %v346_v54 = vsub.f32 %v1006_v14, %v344_v59 }
 0x1f5   : > { %v348_v20 = vand.u32 2147483647, %v346_v54 }
 0x1f7   : > { %v503_v27 = vpop.permute.xlu1 %502 }
 0x1f8   : > { %v514_v37 = vadd.f32 %v513_v24, %v503_v27 }
 0x1fa   : > { %v516_v45 = vsub.f32 %v514_v37, %v1010_v36 }
 0x1fc   : > { %v355_v38 = vpop.permute.xlu1 %354  ;;  %v518_v58 = vmax.f32 %v516_v45, 1e-12 }
 0x1fd   : > { %v362_v10 = vsub.f32 %v355_v38, %v360_v62 }
 0x1fe   : > { %772 = vrcp.f32 %v518_v58 }
 0x1ff   : > { %774 = vrcp.f32 %v544_v61  ;;  %v364_v21 = vand.u32 2147483647, %v362_v10 }
 0x201   : > { %v369_v48 = vpop.permute.xlu1 %368  ;;  %v366_v28 = vadd.f32 %v364_v21, %v348_v20 }
 0x202   : > { %v379_v15 = vsub.f32 %v369_v48, %v378_v4 }
 0x204   : > { %v381_v22 = vand.u32 2147483647, %v379_v15 }
 0x206   : > { %v387_v6 = vpop.permute.xlu1 %386 }
 0x208   : > { %v773_v27 = vpop.eup %772 }
 0x209   : > { %v775_v31 = vpop.eup %774  ;;  %v522_v34 = vmul.f32 %v773_v27, %v1010_v36 }
 0x20a   : > { %v548_v39 = vmul.f32 %v775_v31, %v516_v45 }
 0x22f   : > { %v999_v1 = vpop.f32.mrb[0].mxu0 }
 0x230   : > { %v694_v5 = vpop.f32.mrb[1].mxu0 }
 0x231   : > { %v1004_v8 = vpop.f32.mrb[2].mxu0  ;;  %v396_v5 = vrot.slane %v986_v51, %v395_v57  ;;  %v391_v51 = vpop.permute.xlu1 %390 }
 0x232   : > { %v695_v13 = vpop.f32.mrb[3].mxu0 }
 0x233   : > { %v545_v13 = vmax.f32 %v543_v3, 1e-12  ;;  %v397_v16 = vsub.f32 %v387_v6, %v396_v5  ;;  %v398_v14 = vsub.f32 %v391_v51, %v396_v5 }
 0x235   : > { %v399_v0 = vand.u32 2147483647, %v397_v16  ;;  %v400_v32 = vand.u32 2147483647, %v398_v14 }
 0x247   : > { %v508_v60 = vpop.permute.xlu0 %507 }
 0x248   : > { %v515_v2 = vadd.f32 %v513_v24, %v508_v60 }
 0x24a   : > { %v517_v7 = vsub.f32 %v515_v2, %v470_v63 }
 0x24c   : > { %v519_v11 = vmax.f32 %v517_v7, 1e-12  ;;  %v351_v12 = vpop.permute.xlu0 %350 }
 0x24d   : > { %v361_v17 = vsub.f32 %v351_v12, %v360_v62 }
 0x24e   : > { %776 = vrcp.f32 %v519_v11 }
 0x24f   : > { %v363_v19 = vand.u32 2147483647, %v361_v17  ;;  %778 = vrcp.f32 %v545_v13 }
 0x251   : > { %v365_v23 = vadd.f32 %v363_v19, %v347_v18  ;;  %v373_v24 = vpop.permute.xlu0 %372 }
 0x252   : > { %v380_v25 = vsub.f32 %v373_v24, %v378_v4 }
 0x253   : > { %v383_v26 = vadd.f32 %v381_v22, %v365_v23 }
 0x254   : > { %v382_v29 = vand.u32 2147483647, %v380_v25 }
 0x255   : > { %v401_v30 = vadd.f32 %v399_v0, %v383_v26 }
 0x256   : > { %v384_v33 = vadd.f32 %v382_v29, %v366_v28 }
 0x257   : > { %v403_v35 = vadd.f32 %v401_v30, %v999_v1 }
 0x258   : > { %v777_v37 = vpop.eup %776  ;;  %v402_v38 = vadd.f32 %v400_v32, %v384_v33 }
 0x259   : > { %v523_v40 = vmul.f32 %v777_v37, %v470_v63  ;;  %v524_v41 = vsub.f32 %v403_v35, %v522_v34  ;;  %v779_v43 = vpop.eup %778 }
 0x25a   : > { %v404_v42 = vadd.f32 %v402_v38, %v1004_v8  ;;  %v549_v47 = vmul.f32 %v779_v43, %v517_v7 }
 0x25b   : > { %v550_v44 = vsub.f32 %v524_v41, %v548_v39 }
 0x25c   : > { %v525_v48 = vsub.f32 %v404_v42, %v523_v40 }
 0x25d   : > { %v552_v49 = vadd.f32 1.0, %v550_v44 }
 0x25e   : > { %v551_v36 = vsub.f32 %v525_v48, %v549_v47 }
 0x25f   : > { %554 = vst [vmem:[%s231_s5] sm:$0xff] %v552_v49 }
 0x260   : > { %v553_v1 = vadd.f32 1.0, %v551_v36 }
 0x262   : > { %555 = vst [vmem:[%s231_s5 + $0x8] sm:$0xff] %v553_v1 }
 0x263   : > { %793 = shalt.err (!%p790_p3)
}
 0x264   : > { %s794_s14 = scalar_lea.hbm %s1031_s9, 256  ;;  %s798_s23 = scalar_lea.hbm %s1080_s4, 512 }
 0x265   : > { %p795_p4 = scmp.ne.s32.totalorder %s1031_s9, %s794_s14  ;;  %p799_p9 = scmp.lt.u32.totalorder %s1031_s9, %s1080_s4 }
 0x266   : > { %p800_p10 = scmp.lt.u32.totalorder %s798_s23, %s794_s14  ;;  %p802_p12 = scmp.lt.u32.totalorder %s794_s14, %s1031_s9 }
 0x267   : > { %p796_p7 = pnand %p795_p4, %p922_p5 }
 0x268   : > { %p801_p11 = por %p800_p10, %p799_p9 }
 0x269   : > { %p797_p8 = pneg %p796_p7 }
 0x26a   : > { %p803_p13 = por %p802_p12, %p801_p11 }
 0x26c   : > { %p804_p0 = pnand %p803_p13, %p797_p8 }
 0x26e   : > { %807 = shalt.err (!%p804_p0)
}
 0x26f   : > { %s857_s29 = smov 128   ;;  %s858_s30 = smov 8  }
 0x270   : > { %696 = dma.vmem_to_hbm [thread:$0]  (%p922_p5), %s1033_s6, 256, %s1031_s9, %s1035_s10, %s857_s29, %s857_s29, %s858_s30  }
 0x271 PF: > { %p702_p1 = scmp.ge.s32.totalorder %s842_s18, 2  ;;  %s585_s5 = sand.u32 1, %s830_s15  }
 0x272   : > { %s586_s7 = scalar_lea.sflag [#allocation3], %s585_s5 }
 0x273   : > { %p699_p2 = pnand %p702_p1, %p926_p6 }
 0x275   : > { %825 = dma.done.wait (!%p699_p2), %s586_s7, 256  }
 0x276   : > { %827 = vsyncadd (!%p699_p2), %s586_s7, 4294967040  ;;  %p14_p3 = scmp.ge.s32.totalorder %s909_s21, 4   ;;  %s1083_s15 = smov %s834_s16 }
 0x277   : > { %s1084_s16 = smov %s838_s17  ;;  %s1085_s17 = smov %s920_s24 }
 0x278   : > { %s1086_s18 = smov %s909_s21  ;;  %16 = sbr.rel (!%p14_p3) target bundleno = 3 (0x3), region = 80 }
 0x27f   :  { %591 = vsyncpa [#allocation3], 1 }
 0x280   :  { %593 = vsyncpa [#allocation3 + $0x1], 1 }

</bundles_post_ra>
